<compile_context>
chip_gen: v5e
topology: v5e:2x2
jax: 0.10.0
libtpu: 0.0.40
codegen_flags: <defaults>
</compile_context>

<pallas_src>
import functools

import jax
import jax.numpy as jnp
from jax.experimental import pallas as pl
from jax.experimental.pallas import tpu as pltpu

INPUT_SIZE = 1 * 28 * 28   # 784
HIDDEN_SIZE = 100
CLASSES = 10

H_PAD = 128                # hidden padded to the 128-lane vreg width
C_PAD = 128                # classes padded to the 128-lane vreg width
TB_MAX = 512               # max batch tile (multiple of 8)
# Per-grid-step overhead expressed in "equivalent padded rows" of x DMA
# (~0.35 us/step  ~=  ~500 KB @ 1.4 TB/s  ~=  ~300 rows of bf16 784-wide x).
_STEP_COST_ROWS = 300


def _net_kernel(x_ref, w1_ref, b1_ref, w2_ref, b2_ref, o_ref):
    # x tile: (TB, 784) bf16; w1: (784, 128) bf16; w2: (128, 128) bf16;
    # biases f32; b2 pad lanes are -1e30.
    x = x_ref[...]

    # fc1: bf16 MXU matmul with f32 accumulation, then bias.
    h = jnp.dot(x, w1_ref[...], preferred_element_type=jnp.float32)   # (TB, 128) f32
    h = h + b1_ref[...]

    # Sigmoid via the tanh identity (exact): sigma(h) = 0.5*(tanh(h/2)+1) -> EUP.
    h = 0.5 * (jnp.tanh(0.5 * h) + 1.0)

    # fc2: bf16 MXU matmul with f32 accumulation, then bias (pad classes -1e30).
    logits = jnp.dot(h.astype(jnp.bfloat16), w2_ref[...],
                     preferred_element_type=jnp.float32)              # (TB, 128) f32
    logits = logits + b2_ref[...]

    # Numerically stable softmax over all 128 lanes; pad lanes contribute exp()=0.
    m = jnp.max(logits, axis=-1, keepdims=True)
    e = jnp.exp(logits - m)
    denom = jnp.sum(e, axis=-1, keepdims=True)
    o_ref[...] = (e * pl.reciprocal(denom, approx=True)).astype(o_ref.dtype)


def _prepare_params(w1, b1, w2, b2):
    """Pad hidden/class dims to 128 lanes once, outside the kernel."""
    w1 = jnp.asarray(w1, jnp.float32).reshape(INPUT_SIZE, HIDDEN_SIZE)
    b1 = jnp.asarray(b1, jnp.float32).reshape(1, HIDDEN_SIZE)
    w2 = jnp.asarray(w2, jnp.float32).reshape(HIDDEN_SIZE, CLASSES)
    b2 = jnp.asarray(b2, jnp.float32).reshape(1, CLASSES)

    # Zero-pad w1 columns / b1; zero-pad w2 rows so the dead hidden lanes'
    # sigmoid(0)=0.5 contributes nothing to the logits.
    w1p = jnp.zeros((INPUT_SIZE, H_PAD), jnp.float32).at[:, :HIDDEN_SIZE].set(w1)
    b1p = jnp.zeros((1, H_PAD), jnp.float32).at[:, :HIDDEN_SIZE].set(b1)
    w2p = jnp.zeros((H_PAD, C_PAD), jnp.float32).at[:HIDDEN_SIZE, :CLASSES].set(w2)
    # -1e30 bias in pad class lanes -> exp()==0 in the softmax denominator.
    b2p = jnp.full((1, C_PAD), -1e30, jnp.float32).at[:, :CLASSES].set(b2)

    return w1p.astype(jnp.bfloat16), b1p, w2p.astype(jnp.bfloat16), b2p


def _pick_batch_tile(b: int):
    """Pick (TB, B_pad) minimizing padded-row DMA waste + per-step overhead."""
    b8 = max(8, ((b + 7) // 8) * 8)
    if b8 <= TB_MAX:
        return b8, b8            # one grid step, minimal padding
    best = None
    for tb in (512, 384, 256, 128):
        steps = pl.cdiv(b8, tb)
        b_pad = steps * tb
        cost = b_pad + steps * _STEP_COST_ROWS
        if best is None or cost < best[0]:
            best = (cost, tb, b_pad)
    return best[1], best[2]


@functools.partial(jax.jit, static_argnames=())
def _net_forward_padded(x2d_padded, TB, w1p, b1p, w2p, b2p):
    # Not used directly; kept simple — see net_forward below.
    raise NotImplementedError


def net_forward(x, w1, b1, w2, b2):
    """x: (B, 1, 28, 28) or any shape with 784 trailing elems per sample."""
    x2d = jnp.asarray(x, jnp.float32).reshape(-1, INPUT_SIZE)   # torch .view(-1, 784)
    B = x2d.shape[0]

    TB, B_pad = _pick_batch_tile(B)
    if B_pad != B:
        x2d = jnp.zeros((B_pad, INPUT_SIZE), jnp.float32).at[:B].set(x2d)
    x_bf = x2d.astype(jnp.bfloat16)

    w1p, b1p, w2p, b2p = _prepare_params(w1, b1, w2, b2)

    grid = (B_pad // TB,)
    grid_spec = pltpu.PrefetchScalarGridSpec(
        num_scalar_prefetch=0,
        grid=grid,
        in_specs=[
            pl.BlockSpec((TB, INPUT_SIZE), lambda i: (i, 0)),        # x tile (pipelined)
            pl.BlockSpec((INPUT_SIZE, H_PAD), lambda i: (0, 0)),     # w1 (VMEM-resident)
            pl.BlockSpec((1, H_PAD), lambda i: (0, 0)),              # b1 (VMEM-resident)
            pl.BlockSpec((H_PAD, C_PAD), lambda i: (0, 0)),          # w2 (VMEM-resident)
            pl.BlockSpec((1, C_PAD), lambda i: (0, 0)),              # b2 (VMEM-resident)
        ],
        out_specs=pl.BlockSpec((TB, C_PAD), lambda i: (i, 0)),
    )

    cost = pl.CostEstimate(
        flops=2 * B_pad * INPUT_SIZE * H_PAD + 2 * B_pad * H_PAD * C_PAD,
        transcendentals=B_pad * (H_PAD + C_PAD + 1),
        bytes_accessed=(x_bf.size * 2 + w1p.size * 2 + w2p.size * 2
                        + b1p.size * 4 + b2p.size * 4 + B_pad * C_PAD * 4),
    )

    out_padded = pl.pallas_call(
        _net_kernel,
        out_shape=jax.ShapeDtypeStruct((B_pad, C_PAD), jnp.float32),
        grid_spec=grid_spec,
        compiler_params=pltpu.CompilerParams(
            dimension_semantics=("parallel",)),
        cost_estimate=cost,
    )(x_bf, w1p, b1p, w2p, b2p)

    return out_padded[:B, :CLASSES]


def init_params(key):
    """Deterministic init matching nn.Linear shapes (weights stored as (in, out))."""
    k1, k2, k3, k4 = jax.random.split(key, 4)
    bound1 = 1.0 / jnp.sqrt(INPUT_SIZE)
    bound2 = 1.0 / jnp.sqrt(HIDDEN_SIZE)
    w1 = jax.random.uniform(k1, (INPUT_SIZE, HIDDEN_SIZE),
                            minval=-bound1, maxval=bound1, dtype=jnp.float32)
    b1 = jax.random.uniform(k2, (1, HIDDEN_SIZE),
                            minval=-bound1, maxval=bound1, dtype=jnp.float32)
    w2 = jax.random.uniform(k3, (HIDDEN_SIZE, CLASSES),
                            minval=-bound2, maxval=bound2, dtype=jnp.float32)
    b2 = jax.random.uniform(k4, (1, CLASSES),
                            minval=-bound2, maxval=bound2, dtype=jnp.float32)
    return w1, b1, w2, b2


def _reference_f32(x, w1, b1, w2, b2):
    x2d = x.reshape(-1, INPUT_SIZE).astype(jnp.float32)
    h = jax.nn.sigmoid(x2d @ w1 + b1)
    return jax.nn.softmax(h @ w2 + b2, axis=-1)


if __name__ == "__main__":
    key = jax.random.PRNGKey(0)
    kx, kx2, kp = jax.random.split(key, 3)

    w1, b1, w2, b2 = init_params(kp)

    # Small MNIST-shaped batch, NCHW: (B=2, C=1, H=28, W=28)
    x = jax.random.normal(kx, (2, 1, 28, 28), dtype=jnp.float32)
    out = jax.block_until_ready(net_forward(x, w1, b1, w2, b2))
    ref = _reference_f32(x, w1, b1, w2, b2)
    assert out.shape == (2, CLASSES)
    # bf16 matmuls + approx reciprocal -> compare to the f32 reference loosely.
    assert jnp.allclose(out, ref, atol=1e-2, rtol=0.0)
    assert jnp.allclose(jnp.sum(out, axis=-1), 1.0, atol=1e-2)

    # Larger batch to exercise batch tiling (grid > 1) and row padding.
    x_big = jax.random.normal(kx2, (600, 1, 28, 28), dtype=jnp.float32)
    out_big = jax.block_until_ready(net_forward(x_big, w1, b1, w2, b2))
    ref_big = _reference_f32(x_big, w1, b1, w2, b2)
    assert out_big.shape == (600, CLASSES)
    assert jnp.allclose(out_big, ref_big, atol=1e-2, rtol=0.0)
    assert jnp.allclose(jnp.sum(out_big, axis=-1), 1.0, atol=1e-2)

    print("KERNEL_OK")
</pallas_src>

<mosaic_0001>
module attributes {stable_mosaic.version = 11 : i64} {
  func.func @_net_kernel(%arg0: i32, %arg1: memref<8x784xbf16, #tpu.memory_space<vmem>>, %arg2: memref<784x128xbf16, #tpu.memory_space<vmem>>, %arg3: memref<1x128xf32, #tpu.memory_space<vmem>>, %arg4: memref<128x128xbf16, #tpu.memory_space<vmem>>, %arg5: memref<1x128xf32, #tpu.memory_space<vmem>>, %arg6: memref<8x128xf32, #tpu.memory_space<vmem>>) attributes {dimension_semantics = [#tpu.dimension_semantics<parallel>], iteration_bounds = array<i64: 1>, scalar_prefetch = 0 : i64, scratch_operands = 0 : i64, tpu.core_type = #tpu.core_type<tc>, window_params = [{transform_indices = @transform_0, window_bounds = array<i64: 8, 784>}, {pipeline_mode = #tpu.pipeline_mode<synchronous>, transform_indices = @transform_1, window_bounds = array<i64: 784, 128>}, {pipeline_mode = #tpu.pipeline_mode<synchronous>, transform_indices = @transform_2, window_bounds = array<i64: 1, 128>}, {pipeline_mode = #tpu.pipeline_mode<synchronous>, transform_indices = @transform_3, window_bounds = array<i64: 128, 128>}, {pipeline_mode = #tpu.pipeline_mode<synchronous>, transform_indices = @transform_4, window_bounds = array<i64: 1, 128>}, {transform_indices = @transform_5, window_bounds = array<i64: 8, 128>}]} {
    %c0 = arith.constant 0 : index
    %c0_0 = arith.constant 0 : index
    %0 = vector.load %arg1[%c0, %c0_0] : memref<8x784xbf16, #tpu.memory_space<vmem>>, vector<8x784xbf16>
    %c0_1 = arith.constant 0 : index
    %c0_2 = arith.constant 0 : index
    %1 = vector.load %arg2[%c0_1, %c0_2] : memref<784x128xbf16, #tpu.memory_space<vmem>>, vector<784x128xbf16>
    %cst = arith.constant dense<0.000000e+00> : vector<8x128xf32>
    %2 = tpu.matmul %0, %1, %cst {dimension_numbers = #tpu.dot_dimension_numbers<[1], [0], [0], [1], [0, 0, 1, 1], [], []>} : vector<8x784xbf16>, vector<784x128xbf16>, vector<8x128xf32> -> vector<8x128xf32>
    %c0_3 = arith.constant 0 : index
    %c0_4 = arith.constant 0 : index
    %3 = vector.load %arg3[%c0_3, %c0_4] : memref<1x128xf32, #tpu.memory_space<vmem>>, vector<1x128xf32>
    %4 = vector.broadcast %3 : vector<1x128xf32> to vector<8x128xf32>
    %5 = arith.addf %2, %4 : vector<8x128xf32>
    %cst_5 = arith.constant 5.000000e-01 : f32
    %6 = vector.broadcast %cst_5 : f32 to vector<8x128xf32>
    %7 = arith.mulf %6, %5 : vector<8x128xf32>
    %8 = math.tanh %7 : vector<8x128xf32>
    %cst_6 = arith.constant 1.000000e+00 : f32
    %9 = vector.broadcast %cst_6 : f32 to vector<8x128xf32>
    %10 = arith.addf %8, %9 : vector<8x128xf32>
    %cst_7 = arith.constant 5.000000e-01 : f32
    %11 = vector.broadcast %cst_7 : f32 to vector<8x128xf32>
    %12 = arith.mulf %11, %10 : vector<8x128xf32>
    %13 = arith.truncf %12 : vector<8x128xf32> to vector<8x128xbf16>
    %c0_8 = arith.constant 0 : index
    %c0_9 = arith.constant 0 : index
    %14 = vector.load %arg4[%c0_8, %c0_9] : memref<128x128xbf16, #tpu.memory_space<vmem>>, vector<128x128xbf16>
    %cst_10 = arith.constant dense<0.000000e+00> : vector<8x128xf32>
    %15 = tpu.matmul %13, %14, %cst_10 {dimension_numbers = #tpu.dot_dimension_numbers<[1], [0], [0], [1], [0, 0, 1, 1], [], []>} : vector<8x128xbf16>, vector<128x128xbf16>, vector<8x128xf32> -> vector<8x128xf32>
    %c0_11 = arith.constant 0 : index
    %c0_12 = arith.constant 0 : index
    %16 = vector.load %arg5[%c0_11, %c0_12] : memref<1x128xf32, #tpu.memory_space<vmem>>, vector<1x128xf32>
    %17 = vector.broadcast %16 : vector<1x128xf32> to vector<8x128xf32>
    %18 = arith.addf %15, %17 : vector<8x128xf32>
    %cst_13 = arith.constant dense<0xFF800000> : vector<8xf32>
    %19 = vector.multi_reduction <maximumf>, %18, %cst_13 [1] : vector<8x128xf32> to vector<8xf32>
    %20 = vector.shape_cast %19 : vector<8xf32> to vector<8x1xf32>
    %21 = vector.broadcast %20 : vector<8x1xf32> to vector<8x128xf32>
    %22 = arith.subf %18, %21 : vector<8x128xf32>
    %23 = math.exp %22 : vector<8x128xf32>
    %cst_14 = arith.constant dense<0.000000e+00> : vector<8xf32>
    %24 = vector.multi_reduction <add>, %23, %cst_14 [1] : vector<8x128xf32> to vector<8xf32>
    %25 = vector.shape_cast %24 : vector<8xf32> to vector<8x1xf32>
    %26 = tpu.reciprocal %25 {approx = true} : vector<8x1xf32> -> vector<8x1xf32>
    %27 = vector.broadcast %26 : vector<8x1xf32> to vector<8x128xf32>
    %28 = arith.mulf %23, %27 : vector<8x128xf32>
    %c0_15 = arith.constant 0 : index
    %c0_16 = arith.constant 0 : index
    %29 = vector.load %arg6[%c0_15, %c0_16] : memref<8x128xf32, #tpu.memory_space<vmem>>, vector<8x128xf32>
    tpu.vector_store %arg6[%c0_15, %c0_16], %28 {strides = array<i32>} : memref<8x128xf32, #tpu.memory_space<vmem>>, vector<8x128xf32>,
    return
  }
  func.func @transform_0(%arg0: i32) -> (i32, i32) {
    %c0_i32 = arith.constant 0 : i32
    %c0_i32_0 = arith.constant 0 : i32
    return %arg0, %c0_i32 : i32, i32
  }
  func.func @transform_1(%arg0: i32) -> (i32, i32) {
    %c0_i32 = arith.constant 0 : i32
    %c0_i32_0 = arith.constant 0 : i32
    %c0_i32_1 = arith.constant 0 : i32
    return %c0_i32, %c0_i32_0 : i32, i32
  }
  func.func @transform_2(%arg0: i32) -> (i32, i32) {
    %c0_i32 = arith.constant 0 : i32
    %c0_i32_0 = arith.constant 0 : i32
    %c0_i32_1 = arith.constant 0 : i32
    return %c0_i32, %c0_i32_0 : i32, i32
  }
  func.func @transform_3(%arg0: i32) -> (i32, i32) {
    %c0_i32 = arith.constant 0 : i32
    %c0_i32_0 = arith.constant 0 : i32
    %c0_i32_1 = arith.constant 0 : i32
    return %c0_i32, %c0_i32_0 : i32, i32
  }
  func.func @transform_4(%arg0: i32) -> (i32, i32) {
    %c0_i32 = arith.constant 0 : i32
    %c0_i32_0 = arith.constant 0 : i32
    %c0_i32_1 = arith.constant 0 : i32
    return %c0_i32, %c0_i32_0 : i32, i32
  }
  func.func @transform_5(%arg0: i32) -> (i32, i32) {
    %c0_i32 = arith.constant 0 : i32
    %c0_i32_0 = arith.constant 0 : i32
    return %arg0, %c0_i32 : i32, i32
  }
}

</mosaic_0001>

<bundles_post_ra>
// kernel: tpu_custom_call.1
= control target key start
LH: loop header
LB: loop body
LE: loop exit
PB: predicated region body
PF: predicated region fallthrough
CT: control target
= control target key end

     0   :  { %10 = vsyncpa [#allocation3], 0  ;;  %s1156_s0 = inlined_call_operand.hbm [shape: bf16[8,784], index: 0, kind: input, shape index: {}]   ;;  %s1157_s1 = inlined_call_operand.hbm [shape: bf16[784,128], index: 1, kind: input, shape index: {}]   ;;  %s1158_s2 = inlined_call_operand.vmem [shape: f32[1,128], index: 2, kind: input, shape index: {}]   ;;  %s1159_s3 = inlined_call_operand.hbm [shape: bf16[128,128], index: 3, kind: input, shape index: {}]   ;;  %s1160_s4 = inlined_call_operand.vmem [shape: f32[1,128], index: 4, kind: input, shape index: {}]   ;;  %s1161_s5 = inlined_call_operand.hbm [shape: f32[8,128], index: 5, kind: output, shape index: {}]  }
   0x1   :  { %11 = vsyncpa [#allocation6], 0  ;;  %s28_s20 = sshll.u32 %s1157_s1, 4  ;;  %s29_s20 = int_to_ptr.hbm [resolvable:$true] %s28_s20 }
   0x2   :  { %12 = vsyncpa [#allocation4], 0  ;;  %s1102_s21 = smov [#allocation5]   ;;  %s18_s25 = sshll.u32 %s1156_s0, 4  ;;  %s19_s25 = int_to_ptr.hbm [resolvable:$true] %s18_s25 }
   0x3   :  { %s30_s22 = sshll.u32 %s1102_s21, 4  ;;  %s1103_s26 = smov 64   ;;  %s31_s22 = int_to_ptr.vmem [resolvable:$true] %s30_s22 }
   0x4   :  { %s1104_s27 = smov 4   ;;  %s1105_s28 = smov [#allocation2]  }
   0x5   :  { %36 = dma.hbm_to_vmem [thread:$0]  %s29_s20, 6272, %s31_s22, [#allocation6], %s1103_s26, %s1103_s26, %s1104_s27  }
   0x6   :  { %s20_s29 = sshll.u32 %s1105_s28, 4  ;;  %s43_s7 = sshll.u32 %s1159_s3, 4  ;;  %s21_s29 = int_to_ptr.vmem [resolvable:$true] %s20_s29  ;;  %s44_s7 = int_to_ptr.hbm [resolvable:$true] %s43_s7 }
   0x7   :  { %23 = dma.hbm_to_vmem [thread:$0]  %s19_s25, 448, %s21_s29, [#allocation3]  }
   0x8   :  { %s1106_s1 = smov [#allocation7]  }
   0x9   :  { %s45_s8 = sshll.u32 %s1106_s1, 4  ;;  %s46_s8 = int_to_ptr.vmem [resolvable:$true] %s45_s8 }
   0xa   :  { %51 = dma.hbm_to_vmem [thread:$0]  %s44_s7, 1024, %s46_s8, [#allocation6], %s1103_s26, %s1103_s26, %s1104_s27  }
   0xb   :  { %1096 = dma.done.wait [#allocation3], 448  }
   0xc   :  { %1097 = vsyncadd [#allocation3], 4294966848 }
   0xd   :  { %1098 = dma.done.wait [#allocation6], 7296  }
   0xe   :  { %1099 = vsyncadd [#allocation6], 4294960000  ;;  %v936_v0 = vld [vmem:[#allocation5 + $0x38] sm:$0xff]  ;;  %v935_v3 = vld [vmem:[#allocation5 + $0x30] sm:$0xff]  ;;  %vm491_vm0 = vcmask 130048   ;;  %s1107_s10 = smov [#allocation8]  }
   0xf   :  { %v944_v1 = vld [vmem:[#allocation5 + $0x78] sm:$0xff]  ;;  %495 = vmatpush.bf16.msra.mxu0 %v936_v0  ;;  %v943_v4 = vld [vmem:[#allocation5 + $0x70] sm:$0xff]  ;;  %v934_v8 = vld [vmem:[#allocation5 + $0x28] sm:$0xff]  ;;  %s687_s11 = sshll.u32 %s1107_s10, 4  ;;  %s689_s14 = sshll.u32 %s1161_s5, 4  ;;  %s688_s11 = int_to_ptr.vmem [resolvable:$true] %s687_s11  ;;  %s690_s14 = int_to_ptr.hbm [resolvable:$true] %s689_s14 }
  0x10   :  { %v952_v2 = vld [vmem:[#allocation5 + $0xb8] sm:$0xff]  ;;  %508 = vmatpush.bf16.msra.mxu1 %v944_v1  ;;  %v951_v5 = vld [vmem:[#allocation5 + $0xb0] sm:$0xff]  ;;  %v942_v9 = vld [vmem:[#allocation5 + $0x68] sm:$0xff] }
  0x11   :  { %521 = vmatpush.bf16.msra.mxu2 %v952_v2  ;;  %v960_v6 = vld [vmem:[#allocation5 + $0xf8] sm:$0xff]  ;;  %v959_v7 = vld [vmem:[#allocation5 + $0xf0] sm:$0xff]  ;;  %v950_v10 = vld [vmem:[#allocation5 + $0xa8] sm:$0xff] }
  0x12   :  { %534 = vmatpush.bf16.msra.mxu3 %v960_v6  ;;  %v958_v11 = vld [vmem:[#allocation5 + $0xe8] sm:$0xff]  ;;  %v933_v12 = vld [vmem:[#allocation5 + $0x20] sm:$0xff]  ;;  %v932_v16 = vld [vmem:[#allocation5 + $0x18] sm:$0xff] }
  0x13   :  { %496 = vmatpush.bf16.msra.mxu0 %v935_v3  ;;  %v941_v13 = vld [vmem:[#allocation5 + $0x60] sm:$0xff]  ;;  %v940_v17 = vld [vmem:[#allocation5 + $0x58] sm:$0xff]  ;;  %v931_v20 = vld [vmem:[#allocation5 + $0x10] sm:$0xff] }
  0x14   :  { %509 = vmatpush.bf16.msra.mxu1 %v943_v4  ;;  %v949_v14 = vld [vmem:[#allocation5 + $0xa0] sm:$0xff]  ;;  %v948_v18 = vld [vmem:[#allocation5 + $0x98] sm:$0xff]  ;;  %v939_v21 = vld [vmem:[#allocation5 + $0x50] sm:$0xff] }
  0x15   :  { %522 = vmatpush.bf16.msra.mxu2 %v951_v5  ;;  %v957_v15 = vld [vmem:[#allocation5 + $0xe0] sm:$0xff]  ;;  %v956_v19 = vld [vmem:[#allocation5 + $0xd8] sm:$0xff]  ;;  %v947_v22 = vld [vmem:[#allocation5 + $0x90] sm:$0xff] }
  0x16   :  { %535 = vmatpush.bf16.msra.mxu3 %v959_v7  ;;  %v955_v23 = vld [vmem:[#allocation5 + $0xd0] sm:$0xff]  ;;  %v930_v24 = vld [vmem:[#allocation5 + $0x8] sm:$0xff]  ;;  %v929_v32 = vld [vmem:[#allocation5] sm:$0xff] }
  0x17   :  { %497 = vmatpush.bf16.msra.mxu0 %v934_v8  ;;  %v938_v25 = vld [vmem:[#allocation5 + $0x48] sm:$0xff]  ;;  %v937_v33 = vld [vmem:[#allocation5 + $0x40] sm:$0xff]  ;;  %v968_v34 = vld [vmem:[#allocation5 + $0x138] sm:$0xff] }
  0x18   :  { %510 = vmatpush.bf16.msra.mxu1 %v942_v9  ;;  %v67_v26 = vld [vmem:[#allocation2] sm:$0xff]  ;;  %v68_v28 = vld [vmem:[#allocation2 + $0x8] sm:$0xff]  ;;  %v976_v35 = vld [vmem:[#allocation5 + $0x178] sm:$0xff] }
  0x19   :  { %523 = vmatpush.bf16.msra.mxu2 %v950_v10  ;;  %v946_v27 = vld [vmem:[#allocation5 + $0x88] sm:$0xff]  ;;  %v177_v29 = vunpack.c.l.b16 %v67_v26  ;;  %v178_v31 = vunpack.c.h.b16 %v67_v26  ;;  %v945_v36 = vld [vmem:[#allocation5 + $0x80] sm:$0xff]  ;;  %v179_v37 = vunpack.c.l.b16 %v68_v28  ;;  %v180_v40 = vunpack.c.h.b16 %v68_v28  ;;  %v967_v43 = vld [vmem:[#allocation5 + $0x130] sm:$0xff] }
  0x1a   :  { %536 = vmatpush.bf16.msra.mxu3 %v958_v11  ;;  %v954_v30 = vld [vmem:[#allocation5 + $0xc8] sm:$0xff]  ;;  %v953_v41 = vld [vmem:[#allocation5 + $0xc0] sm:$0xff]  ;;  %v975_v44 = vld [vmem:[#allocation5 + $0x170] sm:$0xff] }
  0x1b   :  { %498 = vmatpush.bf16.msra.mxu0 %v933_v12  ;;  %v184_v38 = vpack.c.b16 %v177_v29, %v177_v29  ;;  %v185_v39 = vpack.c.b16 %v178_v31, %v178_v31  ;;  %v977_v42 = vld [vmem:[#allocation5 + $0x180] sm:$0xff]  ;;  %v186_v45 = vpack.c.b16 %v179_v37, %v179_v37  ;;  %v187_v46 = vpack.c.b16 %v180_v40, %v180_v40  ;;  %v966_v47 = vld [vmem:[#allocation5 + $0x128] sm:$0xff]  ;;  %v70_v51 = vld [vmem:[#allocation2 + $0x18] sm:$0xf] }
  0x1c   :  { %511 = vmatpush.bf16.msra.mxu1 %v941_v13  ;;  %v974_v48 = vld [vmem:[#allocation5 + $0x168] sm:$0xff]  ;;  %v965_v49 = vld [vmem:[#allocation5 + $0x120] sm:$0xff]  ;;  %v964_v52 = vld [vmem:[#allocation5 + $0x118] sm:$0xff]  ;;  %v183_v54 = vunpack.c.l.b16 %v70_v51 }
  0x1d   :  { %524 = vmatpush.bf16.msra.mxu2 %v949_v14  ;;  %v973_v50 = vld [vmem:[#allocation5 + $0x160] sm:$0xff]  ;;  %v972_v53 = vld [vmem:[#allocation5 + $0x158] sm:$0xff]  ;;  %v963_v55 = vld [vmem:[#allocation5 + $0x110] sm:$0xff] }
  0x1e   :  { %537 = vmatpush.bf16.msra.mxu3 %v957_v15  ;;  %v971_v56 = vld [vmem:[#allocation5 + $0x150] sm:$0xff]  ;;  %v190_v57 = vpack.c.b16 %v183_v54, %v183_v54  ;;  %v962_v58 = vld [vmem:[#allocation5 + $0x108] sm:$0xff]  ;;  %v961_v63 = vld [vmem:[#allocation5 + $0x100] sm:$0xff] }
  0x1f   :  { %499 = vmatpush.bf16.msra.mxu0 %v932_v16  ;;  %v970_v59 = vld [vmem:[#allocation5 + $0x148] sm:$0xff]  ;;  %v69_v60 = vld [vmem:[#allocation2 + $0x10] sm:$0xff]  ;;  %v969_v0 = vld [vmem:[#allocation5 + $0x140] sm:$0xff] }
  0x20   :  { %512 = vmatpush.bf16.msra.mxu1 %v940_v17  ;;  %v181_v61 = vunpack.c.l.b16 %v69_v60  ;;  %v182_v62 = vunpack.c.h.b16 %v69_v60  ;;  %v985_v3 = vld [vmem:[#allocation7 + $0x38] sm:$0xff]  ;;  %v984_v4 = vld [vmem:[#allocation7 + $0x30] sm:$0xff]  ;;  %v983_v5 = vld [vmem:[#allocation7 + $0x28] sm:$0xff] }
  0x21   :  { %525 = vmatpush.bf16.msra.mxu2 %v948_v18  ;;  %v982_v6 = vld [vmem:[#allocation7 + $0x20] sm:$0xff]  ;;  %v981_v9 = vld [vmem:[#allocation7 + $0x18] sm:$0xff]  ;;  %v980_v10 = vld [vmem:[#allocation7 + $0x10] sm:$0xff] }
  0x22   :  { %538 = vmatpush.bf16.msra.mxu3 %v956_v19  ;;  %v188_v1 = vpack.c.b16 %v181_v61, %v181_v61  ;;  %v189_v2 = vpack.c.b16 %v182_v62, %v182_v62  ;;  %v979_v13 = vld [vmem:[#allocation7 + $0x8] sm:$0xff]  ;;  %v992_v16 = vld [vmem:[%s1158_s2] ss:$0 sm:$0xff]  ;;  %v978_v17 = vld [vmem:[#allocation7] sm:$0xff] }
  0x23   :  { %500 = vmatpush.bf16.msra.mxu0 %v931_v20 }
  0x24   :  { %513 = vmatpush.bf16.msra.mxu1 %v939_v21 }
  0x25   :  { %526 = vmatpush.bf16.msra.mxu2 %v947_v22 }
  0x26   :  { %539 = vmatpush.bf16.msra.mxu3 %v955_v23 }
  0x27   :  { %501 = vmatpush.bf16.msra.mxu0 %v930_v24 }
  0x28   :  { %514 = vmatpush.bf16.msra.mxu1 %v938_v25 }
  0x29   :  { %527 = vmatpush.bf16.msra.mxu2 %v946_v27 }
  0x2a   :  { %540 = vmatpush.bf16.msra.mxu3 %v954_v30 }
  0x2b   :  { %502 = vmatpush.bf16.msra.mxu0 %v929_v32 }
  0x2c   :  { %515 = vmatpush.bf16.msra.mxu1 %v937_v33 }
  0x2d   :  { %528 = vmatpush.bf16.msra.mxu2 %v945_v36 }
  0x2e   :  { %503 = vmatmul.bf16.vlgmr.msra.gmra.mxu0 %v184_v38  ;;  %541 = vmatpush.bf16.msra.mxu3 %v953_v41  ;;  %v993_v38 = vld [vmem:[%s1160_s4] ss:$0 sm:$0xff] }
  0x2f   :  { %547 = vmatpush.bf16.msrb.mxu0 %v968_v34  ;;  %516 = vmatmul.bf16.vlgmr.msra.gmra.mxu1 %v185_v39 }
  0x30   :  { %560 = vmatpush.bf16.msrb.mxu1 %v976_v35  ;;  %529 = vmatmul.bf16.vlgmr.msra.gmra.mxu2 %v186_v45 }
  0x31   :  { %580 = vmatpush.bf16.msrb.mxu2 %v977_v42  ;;  %542 = vmatmul.bf16.vlgmr.msra.gmra.mxu3 %v187_v46 }
  0x32   :  { %659 = vmatpush.bf16.msrb.mxu3 %v985_v3 }
  0x33   :  { %548 = vmatpush.bf16.msrb.mxu0 %v967_v43 }
  0x34   :  { %561 = vmatpush.bf16.msrb.mxu1 %v975_v44 }
  0x36   :  { %660 = vmatpush.bf16.msrb.mxu3 %v984_v4 }
  0x37   :  { %549 = vmatpush.bf16.msrb.mxu0 %v966_v47 }
  0x38   :  { %562 = vmatpush.bf16.msrb.mxu1 %v974_v48 }
  0x3a   :  { %661 = vmatpush.bf16.msrb.mxu3 %v983_v5 }
  0x3b   :  { %550 = vmatpush.bf16.msrb.mxu0 %v965_v49 }
  0x3c   :  { %563 = vmatpush.bf16.msrb.mxu1 %v973_v50 }
  0x3e   :  { %662 = vmatpush.bf16.msrb.mxu3 %v982_v6 }
  0x3f   :  { %551 = vmatpush.bf16.msrb.mxu0 %v964_v52 }
  0x40   :  { %564 = vmatpush.bf16.msrb.mxu1 %v972_v53  ;;  %896 = vmatmul.msk.bf16.vlgmr.msrb.gmra.mxu2 %vm491_vm0, %v190_v57 }
  0x42   :  { %663 = vmatpush.bf16.msrb.mxu3 %v981_v9 }
  0x43   :  { %552 = vmatpush.bf16.msrb.mxu0 %v963_v55 }
  0x44   :  { %565 = vmatpush.bf16.msrb.mxu1 %v971_v56 }
  0x46   :  { %664 = vmatpush.bf16.msrb.mxu3 %v980_v10 }
  0x47   :  { %553 = vmatpush.bf16.msrb.mxu0 %v962_v58 }
  0x48   :  { %566 = vmatpush.bf16.msrb.mxu1 %v970_v59 }
  0x4a   :  { %665 = vmatpush.bf16.msrb.mxu3 %v979_v13 }
  0x4b   :  { %554 = vmatpush.bf16.msrb.mxu0 %v961_v63 }
  0x4c   :  { %567 = vmatpush.bf16.msrb.mxu1 %v969_v0 }
  0x4e   :  { %555 = vmatmul.bf16.vlgmr.msrb.gmra.mxu0 %v188_v1  ;;  %666 = vmatpush.bf16.msrb.mxu3 %v978_v17 }
  0x4f   :  { %568 = vmatmul.bf16.vlgmr.msrb.gmra.mxu1 %v189_v2 }
  0xab   :  { %v504_v7 = vpop.f32.mrf.mxu0 }
  0xac   :  { %v517_v8 = vpop.f32.mrf.mxu1  ;;  %v505_v18 = vadd.f32 %v992_v16, %v504_v7 }
  0xae   :  { %v518_v21 = vadd.f32 %v517_v8, %v505_v18 }
  0xb3   :  { %v506_v11 = vpop.f32.mrf.mxu0  ;;  %v530_v14 = vpop.f32.mrf.mxu2 }
  0xb4   :  { %v519_v12 = vpop.f32.mrf.mxu1  ;;  %v543_v15 = vpop.f32.mrf.mxu3  ;;  %v531_v22 = vadd.f32 %v530_v14, %v518_v21 }
  0xb6   :  { %v544_v24 = vadd.f32 %v543_v15, %v531_v22 }
  0xbb   :  { %v532_v19 = vpop.f32.mrf.mxu2 }
  0xbc   :  { %v545_v20 = vpop.f32.mrf.mxu3 }
  0xc3   :  { %v582_v23 = vpop.f32.mrf.mxu2 }
  0xcb   :  { %v556_v25 = vpop.f32.mrf.mxu0  ;;  %v584_v29 = vpop.f32.mrf.mxu2 }
  0xcc   :  { %v569_v26 = vpop.f32.mrf.mxu1  ;;  %v557_v27 = vadd.f32 %v556_v25, %v544_v24 }
  0xce   :  { %v570_v28 = vadd.f32 %v569_v26, %v557_v27 }
  0xd0   :  { %v583_v30 = vadd.f32 %v582_v23, %v570_v28 }
  0xd2   :  { %v586_v31 = vmul.f32 0.5, %v583_v30 }
  0xd3   :  { %v558_v32 = vpop.f32.mrf.mxu0 }
  0xd4   :  { %v571_v33 = vpop.f32.mrf.mxu1  ;;  %994 = vtanh.f32 %v586_v31 }
  0xda   :  { %v995_v34 = vpop.eup %994 }
  0xdb   :  { %v588_v35 = vadd.f32 1.0, %v995_v34 }
  0xdd   :  { %v589_v36 = vmul.f32 0.5, %v588_v35 }
  0xdf   :  { %v590_v37 = vpack.c.bf16 %v589_v36, %v589_v36 }
  0xe1   :  { %667 = vmatmul.bf16.vlgmr.msrb.gmra.mxu3 %v590_v37 }
 0x164   :  { %v668_v39 = vpop.f32.mrf.mxu3 }
 0x165   :  { %v669_v40 = vadd.f32 %v993_v38, %v668_v39 }
 0x167   :  { %672 = vmax.xlane.f32.xlu0 %v669_v40 }
 0x16c   :  { %v670_v41 = vpop.f32.mrf.mxu3 }
 0x1da   :  { %v673_v42 = vpop.xlane.xlu0 %672 }
 0x1db   :  { %v674_v43 = vsub.f32 %v669_v40, %v673_v42 }
 0x1dd   :  { %v675_v44 = vmul.f32 1.442695, %v674_v43 }
 0x1df   :  { %996 = vpow2.f32 %v675_v44 }
 0x1e5   :  { %v997_v45 = vpop.eup %996 }
 0x1e6   :  { %677 = vadd.xlane.f32.xlu0 %v997_v45 }
 0x259   :  { %v678_v46 = vpop.xlane.xlu0 %677 }
 0x25a   :  { %998 = vrcp.f32 %v678_v46 }
 0x260   :  { %v999_v47 = vpop.eup %998 }
 0x261   :  { %v680_v48 = vmul.f32 %v999_v47, %v997_v45 }
 0x263   :  { %681 = vst [vmem:[#allocation8] sm:$0xff] %v680_v48 }
 0x264   :  { %692 = dma.vmem_to_hbm [thread:$0]  %s688_s11, 128, %s690_s14, [#allocation4]  }
 0x265   :  { %1100 = dma.done.wait [#allocation4], 128  }
 0x266   :  { %1101 = vsyncadd [#allocation4], 4294967168 }
 0x267   :  { %697 = vsyncpa [#allocation3], 1 }
 0x268   :  { %698 = vsyncpa [#allocation6], 1 }
 0x269   :  { %699 = vsyncpa [#allocation4], 1 }

</bundles_post_ra>
